<compile_context>
chip_gen: v5e
topology: v5e:2x2
jax: 0.10.0
libtpu: 0.0.40
codegen_flags: <defaults>
</compile_context>

<pallas_src>
import functools

import jax
import jax.numpy as jnp
from jax import lax
from jax.experimental import pallas as pl
from jax.experimental.pallas import tpu as pltpu

_NEG_INF = float("-inf")

# "A @ B^T": contract the LAST dim of both operands (flash-attention's q @ k^T
# dimension numbers) -> single MXU matmul, no explicit operand transpose.
_NT_DIMS = (((1,), (1,)), ((), ()))


def _attention_kernel(x_ref, wt_ref, b_ref, u_row_ref, o_ref,
                      m_sc, l_sc, acc_sc, *, n_rows, tile_n, needs_mask):
    i = pl.program_id(0)

    @pl.when(i == 0)
    def _():
        m_sc[...] = jnp.full_like(m_sc, _NEG_INF)
        l_sc[...] = jnp.zeros_like(l_sc)
        acc_sc[...] = jnp.zeros_like(acc_sc)

    x = x_ref[...]                                          # (tile_n, D) f32

    # u = tanh(x @ W^T + b).  Big matmul in wt's dtype (bf16 by default) with
    # f32 accumulation; bias add in f32; tanh in u_row's dtype (bf16 on v6e/v7x).
    u_acc = jnp.dot(x.astype(wt_ref.dtype), wt_ref[...],
                    preferred_element_type=jnp.float32)     # (tile_n, D) f32
    u = jnp.tanh((u_acc + b_ref[...]).astype(u_row_ref.dtype))

    # scores in LANE-MAJOR layout: (1, tile_n) = u_att (1, D) contracted with
    # u (tile_n, D) over D.  Avoids the (tile_n, 1) one-lane-per-vreg layout.
    scores = lax.dot_general(u_row_ref[...], u, _NT_DIMS,
                             preferred_element_type=jnp.float32)  # (1, tile_n)

    if needs_mask:
        # Only emitted when x was zero-padded to a tile multiple (static check);
        # a few lane-major vregs of iota / cmp / select.
        col = i * tile_n + lax.broadcasted_iota(jnp.int32, (1, tile_n), 1)
        scores = jnp.where(col < n_rows, scores, _NEG_INF)

    # Online softmax across N tiles; all state is (1, tile_n) / (1, 1).
    m_prev = m_sc[...]                                               # (1, 1)
    m_new = jnp.maximum(m_prev, jnp.max(scores, axis=1, keepdims=True))
    corr = jnp.exp(m_prev - m_new)                                   # (1, 1)
    p = jnp.exp(scores - m_new)                                      # (1, tile_n)

    l_sc[...] = corr * l_sc[...] + jnp.sum(p, axis=1, keepdims=True)

    # alpha-weighted sum of x on the MXU: (1, tile_n) @ (tile_n, D) -> (1, D).
    # Kept f32 so the output tracks the f32 reference tightly.
    acc_sc[...] = corr * acc_sc[...] + jnp.dot(p, x, preferred_element_type=jnp.float32)
    m_sc[...] = m_new

    @pl.when(i == pl.num_programs(0) - 1)
    def _():
        # Single exact normalize at the end.
        o_ref[...] = (acc_sc[...] / l_sc[...]).astype(o_ref.dtype)


def _vmem_capacity_bytes():
    try:
        cap = int(pltpu.get_tpu_info().vmem_capacity_bytes)
        if cap > 0:
            return cap
    except Exception:
        pass
    return 64 * 1024 * 1024          # conservative fallback (v7x per-TC VMEM)


def _tanh_dtype():
    """bf16 VPU/EUP exists on v6e/v7x; on v5e and older bf16 only adds casts."""
    try:
        kind = jax.devices()[0].device_kind.lower()
    except Exception:
        return jnp.float32
    if any(v in kind for v in ("v2", "v3", "v4", "v5")):
        return jnp.float32
    return jnp.bfloat16


def _resident_vmem_bytes(d, wt_itemsize, att_itemsize):
    # Constant-index-map inputs and the output are still double-buffered by the
    # default pipeline -> count them twice.  Scratch (m, l, acc) padded.
    per_buf = d * d * wt_itemsize + d * 4 + d * att_itemsize + d * 4
    scratch = 3 * 8 * max(d, 128) * 4
    return 2 * per_buf + scratch


def _choose_tile_n(n, d, vmem_cap, resident_bytes):
    """N-tile: multiple of 8, sized against ~75% of this generation's VMEM
    (x tile is double-buffered), capped at 1024 (64 MiB chips) / 2048 (128 MiB)."""
    n_pad8 = 8 * ((n + 7) // 8)
    max_tile = 2048 if vmem_cap >= (96 << 20) else 1024
    budget = max(vmem_cap * 3 // 4 - resident_bytes, 2 * 8 * d * 4)
    tile_cap = max(8, (budget // (2 * d * 4)) // 8 * 8)
    return int(max(8, min(n_pad8, max_tile, tile_cap)))


def attention_forward(x, w, b, u_att, *, precise=False, tile_n=None):
    """Pallas port of Attention.forward.

    x: (N, D) f32; w: (D, D) torch Linear weight (y = x @ w.T + b); b, u_att: (D,).
    Returns (D,) f32.  precise=True keeps every stage in f32 (for tight checks);
    the default runs the dominant matmul in bf16 with f32 accumulation.
    """
    x = jnp.asarray(x, jnp.float32)
    n, d = x.shape

    if precise:
        matmul_dtype = jnp.float32
        tanh_dtype = jnp.float32
    else:
        matmul_dtype = jnp.bfloat16
        tanh_dtype = _tanh_dtype()

    vmem_cap = _vmem_capacity_bytes()
    resident = _resident_vmem_bytes(d, jnp.dtype(matmul_dtype).itemsize,
                                    jnp.dtype(tanh_dtype).itemsize)
    if tile_n is None:
        tile_n = _choose_tile_n(n, d, vmem_cap, resident)
    else:
        tile_n = max(8, (int(tile_n) // 8) * 8)

    num_tiles = pl.cdiv(n, tile_n)
    n_pad = num_tiles * tile_n
    needs_mask = (n_pad != n)
    if needs_mask:
        x = jnp.pad(x, ((0, n_pad - n), (0, 0)))

    # Static parameter prep (once, outside the kernel): transpose W, cast the MXU
    # weight, and lay u_att out as a lane-major row in the tanh compute dtype.
    wt = jnp.asarray(w, jnp.float32).T.astype(matmul_dtype)          # (D, D)
    b2 = jnp.asarray(b, jnp.float32).reshape(1, d)                   # (1, D) f32
    u_row = jnp.asarray(u_att, jnp.float32).reshape(1, d).astype(tanh_dtype)

    kernel = functools.partial(_attention_kernel, n_rows=n, tile_n=tile_n,
                               needs_mask=needs_mask)

    # Explicit VMEM limit derived from the chosen tile, counting the default
    # double-buffering of every operand; capped below physical capacity.
    needed = resident + 2 * tile_n * d * 4 + (1 << 20)
    vmem_limit = int(min(max(needed, 16 << 20), vmem_cap * 9 // 10))

    out = pl.pallas_call(
        kernel,
        out_shape=jax.ShapeDtypeStruct((1, d), jnp.float32),
        grid_spec=pltpu.PrefetchScalarGridSpec(
            num_scalar_prefetch=0,
            grid=(num_tiles,),
            in_specs=[
                pl.BlockSpec((tile_n, d), lambda i: (i, 0)),   # x: streamed over N
                pl.BlockSpec((d, d), lambda i: (0, 0)),        # W^T: resident
                pl.BlockSpec((1, d), lambda i: (0, 0)),        # bias: resident
                pl.BlockSpec((1, d), lambda i: (0, 0)),        # u_att row: resident
            ],
            out_specs=pl.BlockSpec((1, d), lambda i: (0, 0)),
            scratch_shapes=[
                pltpu.VMEM((1, 1), jnp.float32),   # running max m
                pltpu.VMEM((1, 1), jnp.float32),   # running denom l
                pltpu.VMEM((1, d), jnp.float32),   # running weighted sum
            ],
        ),
        compiler_params=pltpu.CompilerParams(
            dimension_semantics=("arbitrary",),     # online-softmax reduction axis
            vmem_limit_bytes=vmem_limit,
        ),
    )(x, wt, b2, u_row)
    return out[0]


def attention_reference(x, w, b, u_att):
    u = jnp.tanh(x @ w.T + b)
    scores = u @ u_att
    alpha = jax.nn.softmax(scores, axis=-1)
    return jnp.sum(alpha[:, None] * x, axis=0)


if __name__ == "__main__":
    key = jax.random.PRNGKey(0)

    def make_case(n, d, case_key):
        kx, kw, kb, ku = jax.random.split(case_key, 4)
        x = jax.random.normal(kx, (n, d), dtype=jnp.float32)
        # Deterministic parameter init (module defines Linear(D, D), u_att (D,)).
        # u_att is zeros in torch __init__; small random values exercise softmax/tanh.
        w = jax.random.normal(kw, (d, d), dtype=jnp.float32) * (1.0 / jnp.sqrt(d))
        b = jax.random.normal(kb, (d,), dtype=jnp.float32) * 0.1
        u_att = jax.random.normal(ku, (d,), dtype=jnp.float32) * 0.1
        return x, w, b, u_att

    k1, k2 = jax.random.split(key)

    # Module-scale shape (seq N=8, input_size D=32): single tile.
    x, w, b, u = make_case(8, 32, k1)
    ref = attention_reference(x, w, b, u)
    out = jax.block_until_ready(attention_forward(x, w, b, u, precise=True))
    assert out.shape == (32,)
    assert jnp.allclose(out, ref, atol=1e-4, rtol=1e-4), "precise mismatch (8, 32)"
    out = jax.block_until_ready(attention_forward(x, w, b, u))
    assert jnp.allclose(out, ref, atol=3e-2, rtol=1e-1), "bf16 mismatch (8, 32)"

    # Larger shape with a forced small tile: exercises multi-tile online softmax
    # plus padded-row masking (768 padded rows vs 700 valid).
    x, w, b, u = make_case(700, 128, k2)
    ref = attention_reference(x, w, b, u)
    out = jax.block_until_ready(attention_forward(x, w, b, u, precise=True, tile_n=256))
    assert jnp.allclose(out, ref, atol=2e-4, rtol=1e-3), "precise mismatch (700, 128)"
    out = jax.block_until_ready(attention_forward(x, w, b, u, tile_n=256))
    assert jnp.allclose(out, ref, atol=1.5e-2, rtol=1e-1), "bf16 mismatch (700, 128)"
    # Auto tile selection path (single tile on all generations at this size).
    out = jax.block_until_ready(attention_forward(x, w, b, u))
    assert jnp.allclose(out, ref, atol=1.5e-2, rtol=1e-1), "auto-tile mismatch (700, 128)"

    print("KERNEL_OK")
</pallas_src>

<mosaic_0001>
module attributes {stable_mosaic.version = 11 : i64} {
  func.func @_attention_kernel(%arg0: i32, %arg1: memref<8x32xf32, #tpu.memory_space<vmem>>, %arg2: memref<32x32xf32, #tpu.memory_space<vmem>>, %arg3: memref<1x32xf32, #tpu.memory_space<vmem>>, %arg4: memref<1x32xf32, #tpu.memory_space<vmem>>, %arg5: memref<1x32xf32, #tpu.memory_space<vmem>>, %arg6: memref<1x1xf32, #tpu.memory_space<vmem>>, %arg7: memref<1x1xf32, #tpu.memory_space<vmem>>, %arg8: memref<1x32xf32, #tpu.memory_space<vmem>>) attributes {dimension_semantics = [#tpu.dimension_semantics<arbitrary>], iteration_bounds = array<i64: 1>, scalar_prefetch = 0 : i64, scratch_operands = 3 : i64, tpu.core_type = #tpu.core_type<tc>, window_params = [{transform_indices = @transform_0, window_bounds = array<i64: 8, 32>}, {pipeline_mode = #tpu.pipeline_mode<synchronous>, transform_indices = @transform_1, window_bounds = array<i64: 32, 32>}, {pipeline_mode = #tpu.pipeline_mode<synchronous>, transform_indices = @transform_2, window_bounds = array<i64: 1, 32>}, {pipeline_mode = #tpu.pipeline_mode<synchronous>, transform_indices = @transform_3, window_bounds = array<i64: 1, 32>}, {pipeline_mode = #tpu.pipeline_mode<synchronous>, transform_indices = @transform_4, window_bounds = array<i64: 1, 32>}]} {
    %c0_i32 = arith.constant 0 : i32
    %0 = arith.cmpi eq, %arg0, %c0_i32 : i32
    %1 = arith.extui %0 : i1 to i32
    %c0_i32_0 = arith.constant 0 : i32
    %2 = arith.cmpi ne, %1, %c0_i32_0 : i32
    scf.if %2 {
      %cst_26 = arith.constant 0xFF800000 : f32
      %37 = vector.broadcast %cst_26 : f32 to vector<1x1xf32>
      %c0_27 = arith.constant 0 : index
      %c0_28 = arith.constant 0 : index
      %38 = vector.load %arg6[%c0_27, %c0_28] : memref<1x1xf32, #tpu.memory_space<vmem>>, vector<1x1xf32>
      tpu.vector_store %arg6[%c0_27, %c0_28], %37 {strides = array<i32>} : memref<1x1xf32, #tpu.memory_space<vmem>>, vector<1x1xf32>,
      %cst_29 = arith.constant 0.000000e+00 : f32
      %39 = vector.broadcast %cst_29 : f32 to vector<1x1xf32>
      %c0_30 = arith.constant 0 : index
      %c0_31 = arith.constant 0 : index
      %40 = vector.load %arg7[%c0_30, %c0_31] : memref<1x1xf32, #tpu.memory_space<vmem>>, vector<1x1xf32>
      tpu.vector_store %arg7[%c0_30, %c0_31], %39 {strides = array<i32>} : memref<1x1xf32, #tpu.memory_space<vmem>>, vector<1x1xf32>,
      %cst_32 = arith.constant 0.000000e+00 : f32
      %41 = vector.broadcast %cst_32 : f32 to vector<1x32xf32>
      %c0_33 = arith.constant 0 : index
      %c0_34 = arith.constant 0 : index
      %42 = vector.load %arg8[%c0_33, %c0_34] : memref<1x32xf32, #tpu.memory_space<vmem>>, vector<1x32xf32>
      tpu.vector_store %arg8[%c0_33, %c0_34], %41 {strides = array<i32>} : memref<1x32xf32, #tpu.memory_space<vmem>>, vector<1x32xf32>,
    } else {
    }
    %c0 = arith.constant 0 : index
    %c0_1 = arith.constant 0 : index
    %3 = vector.load %arg1[%c0, %c0_1] : memref<8x32xf32, #tpu.memory_space<vmem>>, vector<8x32xf32>
    %c0_2 = arith.constant 0 : index
    %c0_3 = arith.constant 0 : index
    %4 = vector.load %arg2[%c0_2, %c0_3] : memref<32x32xf32, #tpu.memory_space<vmem>>, vector<32x32xf32>
    %cst = arith.constant dense<0.000000e+00> : vector<8x32xf32>
    %5 = tpu.matmul %3, %4, %cst {dimension_numbers = #tpu.dot_dimension_numbers<[1], [0], [0], [1], [0, 0, 1, 1], [], []>} : vector<8x32xf32>, vector<32x32xf32>, vector<8x32xf32> -> vector<8x32xf32>
    %c0_4 = arith.constant 0 : index
    %c0_5 = arith.constant 0 : index
    %6 = vector.load %arg3[%c0_4, %c0_5] : memref<1x32xf32, #tpu.memory_space<vmem>>, vector<1x32xf32>
    %7 = vector.broadcast %6 : vector<1x32xf32> to vector<8x32xf32>
    %8 = arith.addf %5, %7 : vector<8x32xf32>
    %9 = math.tanh %8 : vector<8x32xf32>
    %c0_6 = arith.constant 0 : index
    %c0_7 = arith.constant 0 : index
    %10 = vector.load %arg4[%c0_6, %c0_7] : memref<1x32xf32, #tpu.memory_space<vmem>>, vector<1x32xf32>
    %cst_8 = arith.constant dense<0.000000e+00> : vector<1x8xf32>
    %11 = tpu.matmul %10, %9, %cst_8 {dimension_numbers = #tpu.dot_dimension_numbers<[1], [1], [0], [0], [0, 0, 1, 0], [], []>} : vector<1x32xf32>, vector<8x32xf32>, vector<1x8xf32> -> vector<1x8xf32>
    %c0_9 = arith.constant 0 : index
    %c0_10 = arith.constant 0 : index
    %12 = vector.load %arg6[%c0_9, %c0_10] : memref<1x1xf32, #tpu.memory_space<vmem>>, vector<1x1xf32>
    %cst_11 = arith.constant dense<0xFF800000> : vector<1xf32>
    %13 = vector.multi_reduction <maximumf>, %11, %cst_11 [1] : vector<1x8xf32> to vector<1xf32>
    %14 = vector.shape_cast %13 : vector<1xf32> to vector<1x1xf32>
    %15 = arith.maximumf %12, %14 : vector<1x1xf32>
    %16 = arith.subf %12, %15 : vector<1x1xf32>
    %17 = math.exp %16 : vector<1x1xf32>
    %18 = vector.broadcast %15 : vector<1x1xf32> to vector<1x8xf32>
    %19 = arith.subf %11, %18 : vector<1x8xf32>
    %20 = math.exp %19 : vector<1x8xf32>
    %c0_12 = arith.constant 0 : index
    %c0_13 = arith.constant 0 : index
    %21 = vector.load %arg7[%c0_12, %c0_13] : memref<1x1xf32, #tpu.memory_space<vmem>>, vector<1x1xf32>
    %22 = arith.mulf %17, %21 : vector<1x1xf32>
    %cst_14 = arith.constant dense<0.000000e+00> : vector<1xf32>
    %23 = vector.multi_reduction <add>, %20, %cst_14 [1] : vector<1x8xf32> to vector<1xf32>
    %24 = vector.shape_cast %23 : vector<1xf32> to vector<1x1xf32>
    %25 = arith.addf %22, %24 : vector<1x1xf32>
    %c0_15 = arith.constant 0 : index
    %c0_16 = arith.constant 0 : index
    %26 = vector.load %arg7[%c0_15, %c0_16] : memref<1x1xf32, #tpu.memory_space<vmem>>, vector<1x1xf32>
    tpu.vector_store %arg7[%c0_15, %c0_16], %25 {strides = array<i32>} : memref<1x1xf32, #tpu.memory_space<vmem>>, vector<1x1xf32>,
    %c0_17 = arith.constant 0 : index
    %c0_18 = arith.constant 0 : index
    %27 = vector.load %arg8[%c0_17, %c0_18] : memref<1x32xf32, #tpu.memory_space<vmem>>, vector<1x32xf32>
    %28 = vector.broadcast %17 : vector<1x1xf32> to vector<1x32xf32>
    %29 = arith.mulf %28, %27 : vector<1x32xf32>
    %cst_19 = arith.constant dense<0.000000e+00> : vector<1x32xf32>
    %30 = tpu.matmul %20, %3, %cst_19 {dimension_numbers = #tpu.dot_dimension_numbers<[1], [0], [0], [1], [0, 0, 1, 1], [], []>} : vector<1x8xf32>, vector<8x32xf32>, vector<1x32xf32> -> vector<1x32xf32>
    %31 = arith.addf %29, %30 : vector<1x32xf32>
    %c0_20 = arith.constant 0 : index
    %c0_21 = arith.constant 0 : index
    %32 = vector.load %arg8[%c0_20, %c0_21] : memref<1x32xf32, #tpu.memory_space<vmem>>, vector<1x32xf32>
    tpu.vector_store %arg8[%c0_20, %c0_21], %31 {strides = array<i32>} : memref<1x32xf32, #tpu.memory_space<vmem>>, vector<1x32xf32>,
    %c0_22 = arith.constant 0 : index
    %c0_23 = arith.constant 0 : index
    %33 = vector.load %arg6[%c0_22, %c0_23] : memref<1x1xf32, #tpu.memory_space<vmem>>, vector<1x1xf32>
    tpu.vector_store %arg6[%c0_22, %c0_23], %15 {strides = array<i32>} : memref<1x1xf32, #tpu.memory_space<vmem>>, vector<1x1xf32>,
    %c0_i32_24 = arith.constant 0 : i32
    %34 = arith.cmpi eq, %arg0, %c0_i32_24 : i32
    %35 = arith.extui %34 : i1 to i32
    %c0_i32_25 = arith.constant 0 : i32
    %36 = arith.cmpi ne, %35, %c0_i32_25 : i32
    scf.if %36 {
      %c0_26 = arith.constant 0 : index
      %c0_27 = arith.constant 0 : index
      %37 = vector.load %arg8[%c0_26, %c0_27] : memref<1x32xf32, #tpu.memory_space<vmem>>, vector<1x32xf32>
      %c0_28 = arith.constant 0 : index
      %c0_29 = arith.constant 0 : index
      %38 = vector.load %arg7[%c0_28, %c0_29] : memref<1x1xf32, #tpu.memory_space<vmem>>, vector<1x1xf32>
      %39 = vector.broadcast %38 : vector<1x1xf32> to vector<1x32xf32>
      %40 = arith.divf %37, %39 : vector<1x32xf32>
      %c0_30 = arith.constant 0 : index
      %c0_31 = arith.constant 0 : index
      %41 = vector.load %arg5[%c0_30, %c0_31] : memref<1x32xf32, #tpu.memory_space<vmem>>, vector<1x32xf32>
      tpu.vector_store %arg5[%c0_30, %c0_31], %40 {strides = array<i32>} : memref<1x32xf32, #tpu.memory_space<vmem>>, vector<1x32xf32>,
    } else {
    }
    return
  }
  func.func @transform_0(%arg0: i32) -> (i32, i32) {
    %c0_i32 = arith.constant 0 : i32
    %c0_i32_0 = arith.constant 0 : i32
    return %arg0, %c0_i32 : i32, i32
  }
  func.func @transform_1(%arg0: i32) -> (i32, i32) {
    %c0_i32 = arith.constant 0 : i32
    %c0_i32_0 = arith.constant 0 : i32
    %c0_i32_1 = arith.constant 0 : i32
    return %c0_i32, %c0_i32_0 : i32, i32
  }
  func.func @transform_2(%arg0: i32) -> (i32, i32) {
    %c0_i32 = arith.constant 0 : i32
    %c0_i32_0 = arith.constant 0 : i32
    %c0_i32_1 = arith.constant 0 : i32
    return %c0_i32, %c0_i32_0 : i32, i32
  }
  func.func @transform_3(%arg0: i32) -> (i32, i32) {
    %c0_i32 = arith.constant 0 : i32
    %c0_i32_0 = arith.constant 0 : i32
    %c0_i32_1 = arith.constant 0 : i32
    return %c0_i32, %c0_i32_0 : i32, i32
  }
  func.func @transform_4(%arg0: i32) -> (i32, i32) {
    %c0_i32 = arith.constant 0 : i32
    %c0_i32_0 = arith.constant 0 : i32
    %c0_i32_1 = arith.constant 0 : i32
    return %c0_i32, %c0_i32_0 : i32, i32
  }
}

</mosaic_0001>

<bundles_post_ra>
// kernel: tpu_custom_call.1
= control target key start
LH: loop header
LB: loop body
LE: loop exit
PB: predicated region body
PF: predicated region fallthrough
CT: control target
= control target key end

     0   :  { %9 = vsyncpa [#allocation6], 0  ;;  %s384_s0 = inlined_call_operand.hbm [shape: f32[8,32], index: 0, kind: input, shape index: {}]   ;;  %s385_s1 = inlined_call_operand.hbm [shape: f32[32,32], index: 1, kind: input, shape index: {}]   ;;  %s386_s2 = inlined_call_operand.vmem [shape: f32[1,32], index: 2, kind: input, shape index: {}]   ;;  %s387_s3 = inlined_call_operand.vmem [shape: f32[1,32], index: 3, kind: input, shape index: {}]   ;;  %s388_s4 = inlined_call_operand.hbm [shape: f32[1,32], index: 4, kind: output, shape index: {}]  }
   0x1   :  { %10 = vsyncpa [#allocation9], 0 }
   0x2   :  { %11 = vsyncpa [#allocation7], 0  ;;  %s17_s17 = sshll.u32 %s384_s0, 4  ;;  %s327_s18 = smov [#allocation5]   ;;  %s18_s17 = int_to_ptr.hbm [resolvable:$true] %s17_s17 }
   0x3   :  { %s19_s19 = sshll.u32 %s327_s18, 4  ;;  %s27_s22 = sshll.u32 %s385_s1, 4  ;;  %s20_s19 = int_to_ptr.vmem [resolvable:$true] %s19_s19  ;;  %s28_s22 = int_to_ptr.hbm [resolvable:$true] %s27_s22 }
   0x4   :  { %22 = dma.hbm_to_vmem [thread:$0]  %s18_s17, 128, %s20_s19, [#allocation6]  }
   0x5   :  { %s328_s23 = smov [#allocation8]   ;;  %s329_s25 = smov 128  }
   0x6   :  { %s29_s24 = sshll.u32 %s328_s23, 4  ;;  %s330_s26 = smov 8   ;;  %s30_s24 = int_to_ptr.vmem [resolvable:$true] %s29_s24 }
   0x7   :  { %35 = dma.hbm_to_vmem [thread:$0]  %s28_s22, 512, %s30_s24, [#allocation9], %s329_s25, %s329_s25, %s330_s26  }
   0x8   :  { %321 = dma.done.wait [#allocation6], 128  }
   0x9   :  { %322 = vsyncadd [#allocation6], 4294967168 }
   0xa   :  { %323 = dma.done.wait [#allocation9], 512  }
   0xb   :  { %324 = vsyncadd [#allocation9], 4294966784  ;;  %v61_v0 = vld [vmem:[#allocation8 + $0x18] sm:$0xff]  ;;  %v60_v1 = vld [vmem:[#allocation8 + $0x10] sm:$0xff]  ;;  %vm66_vm0 = vcmask 261120   ;;  %vm52_vm1 = vcmask 0  }
   0xc   :  { %82 = vmatpush.msra.mxu0 %v61_v0  ;;  %v57_v2 = vld [vmem:[#allocation5] sm:$0xff]  ;;  %v59_v3 = vld [vmem:[#allocation8 + $0x8] sm:$0xff]  ;;  %v58_v4 = vld [vmem:[#allocation8] sm:$0xff]  ;;  %v331_v10 = vmov -inf   ;;  %vm119_vm2 = vcmask 57344   ;;  %v332_v13 = vmov 0  }
   0xd   :  { %171 = vmatpush.msra.mxu2 %v57_v2  ;;  %v240_v5 = vld [vmem:[%s386_s2] ss:$0 sm:$0xff]  ;;  %53 = vst.msk [vmem:[#allocation2] sm:$0x1] %vm52_vm1, %v331_v10  ;;  %237 = vset.pattern.permute.xlu0 %v332_v13  ;;  %v333_v14 = vmov 0.0   ;;  %vm55_vm3 = vcmask 253952  }
   0xe   :  { %83 = vmatpush.msra.mxu0 %v60_v1  ;;  %v91_v9 = vld [vmem:[%s387_s3] sm:$0x1]  ;;  %239 = vset.pattern.permute.xlu2 %v332_v13  ;;  %54 = vst.msk [vmem:[#allocation3] sm:$0x1] %vm52_vm1, %v333_v14  ;;  %vm152_vm4 = vcmask 64512   ;;  %s334_s2 = smov [#allocation10]  }
   0xf   :  { %238 = vset.pattern.permute.xlu1 %v332_v13  ;;  %56 = vst.msk [vmem:[#allocation4] sm:$0x1] %vm55_vm3, %v333_v14  ;;  %s212_s3 = sshll.u32 %s334_s2, 4  ;;  %s214_s5 = sshll.u32 %s388_s4, 4  ;;  %s213_s3 = int_to_ptr.vmem [resolvable:$true] %s212_s3  ;;  %s215_s5 = int_to_ptr.hbm [resolvable:$true] %s214_s5 }
  0x10   :  { %84 = vmatpush.msra.mxu0 %v59_v3 }
  0x12   :  { %85 = vmatpush.msra.mxu0 %v58_v4 }
  0x13   :  { %225 = vmatmul.msk.f32.vlgmr.msra.gmra.mxu0 %vm66_vm0, %v57_v2 }
  0x14   :  { %v118_v15 = vld [vmem:[#allocation2] sm:$0x1] }
  0x15   :  { %v136_v27 = vld [vmem:[#allocation3] sm:$0x1] }
  0x16   :  { %v144_v34 = vld [vmem:[#allocation4] sm:$0x1] }
  0x90   :  { %v87_v6 = vpop.f32.mrf.mxu0 }
  0x91   :  { %v88_v7 = vadd.f32 %v240_v5, %v87_v6 }
  0x93   :  { %241 = vtanh.f32 %v88_v7 }
  0x99   :  { %v242_v8 = vpop.eup %241 }
  0x9a   :  { %226 = vmatpush.xpose.msk.msra.mxu1 %vm66_vm0, %v242_v8 }
  0x9d   :  { %227 = vmatmul.msk.f32.vlgmr.msra.gmra.mxu1 %vm66_vm0, %v91_v9 }
 0x11a   :  { %v115_v11 = vpop.f32.mrf.mxu1 }
 0x11b   :  { %v120_v12 = vsel %vm119_vm2, %v115_v11, -inf }
 0x11c   :  { %121 = vmax.xlane.f32.xlu0 %v120_v12 }
 0x18f   :  { %v122_v16 = vpop.xlane.xlu0 %121 }
 0x190   :  { %v123_v17 = vmax.f32 %v118_v15, %v122_v16 }
 0x192   :  { %v124_v18 = vsub.f32 %v118_v15, %v123_v17  ;;  %179 = vst.msk [vmem:[#allocation2] sm:$0x1] %vm52_vm1, %v123_v17  ;;  %129 = vperm.xlu0 %237, %v123_v17  }
 0x194   :  { %v125_v19 = vmul.f32 1.442695, %v124_v18 }
 0x196   :  { %243 = vpow2.f32 %v125_v19 }
 0x19c   :  { %v244_v20 = vpop.eup %243 }
 0x19d   :  { %147 = vperm.xlu2 %239, %v244_v20   ;;  %v137_v28 = vmul.f32 %v244_v20, %v136_v27 }
 0x1f7   :  { %v148_v31 = vpop.permute.xlu2 %147 }
 0x1f8   :  { %v150_v32 = vperm.slane %v148_v31, 0 }
 0x1fa   :  { %v151_v35 = vmul.f32 %v150_v32, %v144_v34 }
 0x204   :  { %v130_v21 = vpop.permute.xlu0 %129 }
 0x205   :  { %v132_v22 = vperm.slane %v130_v21, 0 }
 0x207   :  { %v133_v23 = vsub.f32 %v115_v11, %v132_v22 }
 0x209   :  { %v134_v24 = vmul.f32 1.442695, %v133_v23 }
 0x20b   :  { %245 = vpow2.f32 %v134_v24 }
 0x211   :  { %v246_v25 = vpop.eup %245 }
 0x212   :  { %228 = vmatmul.msk.f32.vlgmr.msra.gmra.mxu2 %vm152_vm4, %v246_v25  ;;  %v138_v26 = vsel %vm119_vm2, %v246_v25, 0.0 }
 0x213   :  { %139 = vadd.xlane.f32.xlu1 %v138_v26 }
 0x286   :  { %v140_v29 = vpop.xlane.xlu1 %139 }
 0x287   :  { %v141_v30 = vadd.f32 %v140_v29, %v137_v28 }
 0x289   :  { %143 = vst.msk [vmem:[#allocation3] sm:$0x1] %vm52_vm1, %v141_v30 }
 0x290   :  { %v184_v33 = vld [vmem:[#allocation3] sm:$0x1] }
 0x291   :  { %187 = vperm.xlu1 %238, %v184_v33  }
 0x295   :  { %v173_v36 = vpop.f32.mrf.mxu2 }
 0x296   :  { %v176_v37 = vadd.f32 %v173_v36, %v151_v35 }
 0x298   :  { %178 = vst.msk [vmem:[#allocation4] sm:$0x1] %vm55_vm3, %v176_v37 }
 0x29f   :  { %v183_v49 = vld [vmem:[#allocation4] sm:$0x1] }
 0x303   :  { %v188_v38 = vpop.permute.xlu1 %187 }
 0x304   :  { %v190_v39 = vperm.slane %v188_v38, 0 }
 0x306   :  { %247 = vrcp.f32 %v190_v39  ;;  %v202_v43 = vand.u32 2147483648, %v190_v39  ;;  %v200_v45 = vand.u32 2147483647, %v190_v39  ;;  %vm196_vm6 = vweird.f32 %v190_v39 }
 0x308   :  { %v203_v47 = vor.u32 1.1754944e-38, %v202_v43  ;;  %vm201_vm8 = vcmp.eq.f32.partialorder %v200_v45, 8.507059e+37 }
 0x30c   :  { %v248_v40 = vpop.eup %247 }
 0x30d   :  { %v192_v41 = vmul.f32 %v248_v40, %v190_v39  ;;  %vm197_vm5 = vweird.f32 %v248_v40 }
 0x30e   :  { %vm198_vm7 = vmor %vm196_vm6, %vm197_vm5 }
 0x30f   :  { %v193_v42 = vsub.f32 1.0, %v192_v41 }
 0x311   :  { %v194_v44 = vmul.f32 %v248_v40, %v193_v42 }
 0x313   :  { %v195_v46 = vadd.f32 %v248_v40, %v194_v44 }
 0x315   :  { %v199_v48 = vsel %vm198_vm7, %v248_v40, %v195_v46 }
 0x316   :  { %v204_v50 = vsel %vm201_vm8, %v203_v47, %v199_v48 }
 0x317   :  { %v205_v51 = vmul.f32 %v204_v50, %v183_v49 }
 0x319   :  { %206 = vst.msk [vmem:[#allocation10] sm:$0x1] %vm55_vm3, %v205_v51 }
 0x31a   :  { %217 = dma.vmem_to_hbm [thread:$0]  %s213_s3, 16, %s215_s5, [#allocation7]  }
 0x31b   :  { %325 = dma.done.wait [#allocation7], 16  }
 0x31c   :  { %326 = vsyncadd [#allocation7], 4294967280 }
 0x31d   :  { %222 = vsyncpa [#allocation6], 1 }
 0x31e   :  { %223 = vsyncpa [#allocation9], 1 }
 0x31f   :  { %224 = vsyncpa [#allocation7], 1 }

</bundles_post_ra>
